<compile_context>
chip_gen: v6e
topology: v6e:2x2x1
jax: 0.10.0
libtpu: 0.0.40
codegen_flags: <defaults>
</compile_context>

<pallas_src>
import functools

import jax
import jax.numpy as jnp
from jax import lax
from jax.experimental import pallas as pl
from jax.experimental.pallas import tpu as pltpu

_LANE = 128


def _round_up(v, m):
    return ((v + m - 1) // m) * m


def _sublane(itemsize):
    return {4: 8, 2: 16, 1: 32}.get(itemsize, 8)


def _vmem_budget():
    """Returns (vmem_limit_bytes, double_buffered_input_budget) per generation."""
    try:
        cap = int(pltpu.get_tpu_info().vmem_capacity_bytes)
    except Exception:
        cap = 64 * 1024 * 1024                       # conservative (v7x-sized) fallback
    if cap >= 100 * 1024 * 1024:                     # v5e / v6e: 128 MiB physical VMEM
        return 64 * 1024 * 1024, 32 * 1024 * 1024
    return 44 * 1024 * 1024, 24 * 1024 * 1024        # v7x: 64 MiB per TensorCore


def _pick_tile_m(np_rows, w_packed, k, itemsize, buffer_budget):
    """Packed-row tile from the VMEM budget, using lane-padded per-row bytes."""
    x_row = _round_up(w_packed, _LANE) * itemsize            # x block, lane padded
    t_row = _round_up(k, _LANE) * 4                          # int32 targets pad to 512 B/row
    per_row = 2 * (x_row + t_row)                            # double-buffered pipeline
    tm = buffer_budget // per_row
    if tm >= np_rows:
        return np_rows                                       # single full-extent block
    sub = _sublane(itemsize)
    tm = min(tm, 32768)
    return max(sub, (tm // sub) * sub)


def _ls_sigmoid_ce_kernel(x_ref, t_ref, o_ref, *, np_rows, tile_m, base, confidence,
                          needs_mask):
    i = pl.program_id(0)

    x = x_ref[...]                                           # (TM, W) packed rows
    # Single-EUP-push sigmoid: sigmoid(x) = 0.5 * (tanh(x / 2) + 1).
    if x.dtype == jnp.bfloat16:
        # bf16 EUP path (v6e/v7x); epilogue promoted to f32 for accumulation.
        t = jnp.tanh(x * 0.5).astype(jnp.float32)
    else:
        t = jnp.tanh(x.astype(jnp.float32) * 0.5)
    probs = 0.5 * t + 0.5                                    # (TM, W) f32 in [0, 1]

    tcol = t_ref[...]                                        # (TM, K) packed target cols
    tm, w = probs.shape
    k = tcol.shape[1]

    # Fused one-hot gather + smoothing:
    #   weight = smoothing/C  everywhere, + confidence at each row's target column
    #   loss contribution = -sum(probs * weight)
    col = lax.broadcasted_iota(jnp.int32, (1, w), 1)         # lane iota, broadcast over rows
    hit = col == tcol[:, 0:1]
    for j in range(1, k):                                    # k disjoint sub-row targets
        hit = jnp.logical_or(hit, col == tcol[:, j:j + 1])   # sentinel -1 never matches
    wts = jnp.where(hit, jnp.float32(base + confidence), jnp.float32(base))
    weighted = probs * wts                                   # (TM, W) f32

    def _store(val):
        o_ref[...] = jnp.broadcast_to(val.astype(jnp.float32), (1, 1, _LANE))

    if needs_mask:
        last = pl.num_programs(0) - 1

        @pl.when(i == last)
        def _():
            # Only the final tile can be partial: mask packed rows >= np_rows
            # (their VMEM contents are stale/garbage; where() drops any NaNs).
            loss_row = jnp.sum(weighted, axis=-1, keepdims=True)        # (TM, 1)
            rows = i * tile_m + lax.broadcasted_iota(jnp.int32, (tm, 1), 0)
            _store(-jnp.sum(jnp.where(rows < np_rows, loss_row, 0.0)))

        @pl.when(i != last)
        def _():
            _store(-jnp.sum(weighted))
    else:
        _store(-jnp.sum(weighted))


def label_smoothing_sigmoid_cross_entropy(x, target, smoothing=0.1, tile_m=None):
    """Pallas equivalent of LabelSmoothingSigmoidCrossEntropy(smoothing)(x, target)."""
    assert smoothing < 1.0
    n, c = x.shape
    assert target.shape == (n,)
    confidence = 1.0 - smoothing
    base = smoothing / c                      # stays smoothing / C after lane packing
    itemsize = jnp.dtype(x.dtype).itemsize

    # ---- lane packing: view (n, c) as (np_rows, k*c) with k*c <= 128 lanes ----
    k_max = max(1, _LANE // c)
    k = 1
    for cand in range(k_max, 0, -1):          # largest k dividing n -> free reshape
        if n % cand == 0:
            k = cand
            break
    n_pad = 0
    if k == 1 and k_max > 1:
        # No divisor of n fits: pad a few zero rows (one extra copy of x) so the
        # whole streaming pass still runs at full lane utilization.
        k = k_max
        n_pad = (-n) % k

    target = target.astype(jnp.int32)
    if n_pad:
        x = jnp.concatenate([x, jnp.zeros((n_pad, c), x.dtype)], axis=0)
        target = jnp.concatenate([target, jnp.full((n_pad,), -1, jnp.int32)], axis=0)
    n_total = n + n_pad

    np_rows = n_total // k
    w_packed = k * c
    x_packed = x.reshape(np_rows, w_packed)   # free row-major metadata reshape
    offs = (jnp.arange(k, dtype=jnp.int32) * c)[None, :]
    traw = target.reshape(np_rows, k)
    # Absolute packed-column indices; padded rows get a sentinel that never matches.
    tcol = jnp.where(traw >= 0, traw + offs, jnp.int32(-1))

    vmem_limit, buffer_budget = _vmem_budget()
    sub = _sublane(itemsize)
    if tile_m is None:
        tile_m = _pick_tile_m(np_rows, w_packed, k, itemsize, buffer_budget)
    else:
        tile_m = min(int(tile_m), np_rows)
        if tile_m < np_rows:                  # enforce (8,128)-legal sublane multiple
            tile_m = min(max(sub, (tile_m // sub) * sub), np_rows)

    num_tiles = pl.cdiv(np_rows, tile_m)
    needs_mask = (np_rows % tile_m) != 0

    kernel = functools.partial(
        _ls_sigmoid_ce_kernel,
        np_rows=np_rows, tile_m=tile_m, base=base, confidence=confidence,
        needs_mask=needs_mask)

    partials = pl.pallas_call(
        kernel,
        out_shape=jax.ShapeDtypeStruct((num_tiles, 1, _LANE), jnp.float32),
        grid_spec=pltpu.PrefetchScalarGridSpec(
            num_scalar_prefetch=0,
            grid=(num_tiles,),
            in_specs=[
                pl.BlockSpec((tile_m, w_packed), lambda i: (i, 0)),
                pl.BlockSpec((tile_m, k), lambda i: (i, 0)),
            ],
            # one independent partial-sum block per tile -> Mosaic can split any
            # tile count across TensorCores (no odd/even fallback)
            out_specs=pl.BlockSpec((1, 1, _LANE), lambda i: (i, 0, 0)),
        ),
        compiler_params=pltpu.CompilerParams(
            dimension_semantics=("parallel",),
            vmem_limit_bytes=vmem_limit,
        ),
    )(x_packed, tcol)

    # Each zero-padded row contributes exactly -(smoothing/C)*0.5*C = -smoothing/2
    # to the kernel sum (sigmoid(0) = 0.5, sentinel target never hits); add it back.
    total = jnp.sum(partials[:, 0, 0]) + jnp.float32(0.5 * smoothing * n_pad)
    return total / jnp.float32(n)


def _reference(x, target, smoothing=0.1):
    confidence = 1.0 - smoothing
    probs = jax.nn.sigmoid(x.astype(jnp.float32))
    nll = -jnp.take_along_axis(probs, target[:, None].astype(jnp.int32), axis=-1)[:, 0]
    smooth = -jnp.mean(probs, axis=-1)
    return jnp.mean(confidence * nll + smoothing * smooth)


if __name__ == "__main__":
    key = jax.random.PRNGKey(0)
    k1, k2, k3, k4, k5, k6, k7, k8, k9, k10 = jax.random.split(key, 10)
    smoothing = 0.1

    def _check(x, tgt, tile_m=None, atol=1e-5):
        out = jax.block_until_ready(
            label_smoothing_sigmoid_cross_entropy(x, tgt, smoothing=smoothing,
                                                  tile_m=tile_m))
        ref = jax.block_until_ready(_reference(x, tgt, smoothing))
        assert jnp.allclose(out, ref, atol=atol, rtol=1e-3), (out, ref)

    # 1) small main example: N=16, C=32 f32 -> k=4 free pack, single full tile
    x = jax.random.normal(k1, (16, 32), dtype=jnp.float32)
    t = jax.random.randint(k2, (16,), 0, 32, dtype=jnp.int32)
    _check(x, t)

    # 2) padding + multi-tile + partial-last-tile mask: N=49 (no divisor <= 4)
    x = jax.random.normal(k3, (49, 32), dtype=jnp.float32)
    t = jax.random.randint(k4, (49,), 0, 32, dtype=jnp.int32)
    _check(x, t, tile_m=8)

    # 3) bf16 input path (tanh in bf16, f32 accumulation)
    x = jax.random.normal(k5, (32, 32), dtype=jnp.float32).astype(jnp.bfloat16)
    t = jax.random.randint(k6, (32,), 0, 32, dtype=jnp.int32)
    _check(x, t, atol=1e-2)

    # 4) C > 128 -> no packing (k=1), non-128-multiple class width
    x = jax.random.normal(k7, (24, 200), dtype=jnp.float32)
    t = jax.random.randint(k8, (24,), 0, 200, dtype=jnp.int32)
    _check(x, t)

    # 5) non-power-of-two pack factor: N=18, C=32 -> k=3, W=96 lanes
    x = jax.random.normal(k9, (18, 32), dtype=jnp.float32)
    t = jax.random.randint(k10, (18,), 0, 32, dtype=jnp.int32)
    _check(x, t)

    print("KERNEL_OK")
</pallas_src>

<mosaic_0001>
module attributes {stable_mosaic.version = 11 : i64} {
  func.func @_ls_sigmoid_ce_kernel(%arg0: i32, %arg1: memref<4x128xf32, #tpu.memory_space<vmem>>, %arg2: memref<4x4xi32, #tpu.memory_space<vmem>>, %arg3: memref<1x1x128xf32, #tpu.memory_space<vmem>>) attributes {dimension_semantics = [#tpu.dimension_semantics<parallel>], iteration_bounds = array<i64: 1>, scalar_prefetch = 0 : i64, scratch_operands = 0 : i64, tpu.core_type = #tpu.core_type<tc>, window_params = [{transform_indices = @transform_0, window_bounds = array<i64: 4, 128>}, {transform_indices = @transform_1, window_bounds = array<i64: 4, 4>}, {transform_indices = @transform_2, window_bounds = array<i64: 1, 1, 128>}]} {
    %c0 = arith.constant 0 : index
    %c0_0 = arith.constant 0 : index
    %0 = vector.load %arg1[%c0, %c0_0] : memref<4x128xf32, #tpu.memory_space<vmem>>, vector<4x128xf32>
    %cst = arith.constant 5.000000e-01 : f32
    %1 = vector.broadcast %cst : f32 to vector<4x128xf32>
    %2 = arith.mulf %0, %1 : vector<4x128xf32>
    %3 = math.tanh %2 : vector<4x128xf32>
    %cst_1 = arith.constant 5.000000e-01 : f32
    %4 = vector.broadcast %cst_1 : f32 to vector<4x128xf32>
    %5 = arith.mulf %4, %3 : vector<4x128xf32>
    %cst_2 = arith.constant 5.000000e-01 : f32
    %6 = vector.broadcast %cst_2 : f32 to vector<4x128xf32>
    %7 = arith.addf %5, %6 : vector<4x128xf32>
    %c0_3 = arith.constant 0 : index
    %c0_4 = arith.constant 0 : index
    %8 = vector.load %arg2[%c0_3, %c0_4] : memref<4x4xi32, #tpu.memory_space<vmem>>, vector<4x4xi32>
    %9 = tpu.iota {dimensions = array<i32: 1>} : vector<1x128xi32>
    %10 = vector.extract_strided_slice %8 {offsets = [0, 0], sizes = [4, 1], strides = [1, 1]} : vector<4x4xi32> to vector<4x1xi32>
    %11 = vector.broadcast %9 : vector<1x128xi32> to vector<4x128xi32>
    %12 = vector.broadcast %10 : vector<4x1xi32> to vector<4x128xi32>
    %13 = arith.cmpi eq, %11, %12 : vector<4x128xi32>
    %14 = vector.extract_strided_slice %8 {offsets = [0, 1], sizes = [4, 1], strides = [1, 1]} : vector<4x4xi32> to vector<4x1xi32>
    %15 = vector.broadcast %9 : vector<1x128xi32> to vector<4x128xi32>
    %16 = vector.broadcast %14 : vector<4x1xi32> to vector<4x128xi32>
    %17 = arith.cmpi eq, %15, %16 : vector<4x128xi32>
    %18 = arith.ori %13, %17 : vector<4x128xi1>
    %19 = vector.extract_strided_slice %8 {offsets = [0, 2], sizes = [4, 1], strides = [1, 1]} : vector<4x4xi32> to vector<4x1xi32>
    %20 = vector.broadcast %9 : vector<1x128xi32> to vector<4x128xi32>
    %21 = vector.broadcast %19 : vector<4x1xi32> to vector<4x128xi32>
    %22 = arith.cmpi eq, %20, %21 : vector<4x128xi32>
    %23 = arith.ori %18, %22 : vector<4x128xi1>
    %24 = vector.extract_strided_slice %8 {offsets = [0, 3], sizes = [4, 1], strides = [1, 1]} : vector<4x4xi32> to vector<4x1xi32>
    %25 = vector.broadcast %9 : vector<1x128xi32> to vector<4x128xi32>
    %26 = vector.broadcast %24 : vector<4x1xi32> to vector<4x128xi32>
    %27 = arith.cmpi eq, %25, %26 : vector<4x128xi32>
    %28 = arith.ori %23, %27 : vector<4x128xi1>
    %cst_5 = arith.constant 0.903124988 : f32
    %cst_6 = arith.constant 3.125000e-03 : f32
    %29 = vector.broadcast %cst_5 : f32 to vector<4x128xf32>
    %30 = vector.broadcast %cst_6 : f32 to vector<4x128xf32>
    %31 = arith.select %28, %29, %30 : vector<4x128xi1>, vector<4x128xf32>
    %32 = arith.mulf %7, %31 : vector<4x128xf32>
    %33 = vector.shape_cast %32 : vector<4x128xf32> to vector<1x4x128xf32>
    %cst_7 = arith.constant dense<0.000000e+00> : vector<1xf32>
    %34 = vector.multi_reduction <add>, %33, %cst_7 [1, 2] : vector<1x4x128xf32> to vector<1xf32>
    %35 = vector.shape_cast %34 : vector<1xf32> to vector<1x1x1xf32>
    %36 = vector.extract %35[0, 0, 0] : f32 from vector<1x1x1xf32>
    %cst_8 = arith.constant 0.000000e+00 : f32
    %37 = arith.subf %cst_8, %36 : f32
    %38 = vector.broadcast %37 : f32 to vector<1x1x128xf32>
    %c0_9 = arith.constant 0 : index
    %c0_10 = arith.constant 0 : index
    %c0_11 = arith.constant 0 : index
    %39 = vector.load %arg3[%c0_9, %c0_10, %c0_11] : memref<1x1x128xf32, #tpu.memory_space<vmem>>, vector<1x1x128xf32>
    tpu.vector_store %arg3[%c0_9, %c0_10, %c0_11], %38 {strides = array<i32>} : memref<1x1x128xf32, #tpu.memory_space<vmem>>, vector<1x1x128xf32>,
    return
  }
  func.func @transform_0(%arg0: i32) -> (i32, i32) {
    %c0_i32 = arith.constant 0 : i32
    %c0_i32_0 = arith.constant 0 : i32
    return %arg0, %c0_i32 : i32, i32
  }
  func.func @transform_1(%arg0: i32) -> (i32, i32) {
    %c0_i32 = arith.constant 0 : i32
    %c0_i32_0 = arith.constant 0 : i32
    return %arg0, %c0_i32 : i32, i32
  }
  func.func @transform_2(%arg0: i32) -> (i32, i32, i32) {
    %c0_i32 = arith.constant 0 : i32
    %c0_i32_0 = arith.constant 0 : i32
    %c0_i32_1 = arith.constant 0 : i32
    return %arg0, %c0_i32, %c0_i32_0 : i32, i32, i32
  }
}

</mosaic_0001>

<bundles_post_ra>
// kernel: tpu_custom_call.1
= control target key start
LH: loop header
LB: loop body
LE: loop exit
PB: predicated region body
PF: predicated region fallthrough
CT: control target
= control target key end

     0   :  { %7 = vsyncpa [#allocation3], 0  ;;  %s210_s0 = inlined_call_operand.hbm [shape: f32[4,128], index: 0, kind: input, shape index: {}]   ;;  %s211_s1 = inlined_call_operand.hbm [shape: s32[4,4], index: 1, kind: input, shape index: {}]   ;;  %s212_s2 = inlined_call_operand.hbm [shape: f32[1,1,128], index: 2, kind: output, shape index: {}]  }
   0x1   :  { %8 = vsyncpa [#allocation6], 0 }
   0x2   :  { %9 = vsyncpa [#allocation4], 0  ;;  %s178_s9 = smov [#allocation2]   ;;  %s179_s11 = smov [#allocation5]  }
   0x3   :  { %s16_s10 = sshll.u32 %s178_s9, 4  ;;  %s26_s12 = sshll.u32 %s179_s11, 4  ;;  %s17_s10 = int_to_ptr.vmem [resolvable:$true] %s16_s10  ;;  %s27_s12 = int_to_ptr.vmem [resolvable:$true] %s26_s12 }
   0x4   :  { %s120_s13 = scalar_lea.vmem %s17_s10, 64  ;;  %p125_p1 = scmp.lt.s32.totalorder %s17_s10, %s17_s10 }
   0x5   :  { %p121_p0 = scmp.ne.s32.totalorder %s17_s10, %s120_s13  ;;  %p126_p2 = scmp.lt.s32.totalorder %s120_s13, %s120_s13 }
   0x7   :  { %p127_p3 = por %p126_p2, %p125_p1 }
   0x9   :  { %p128_p4 = pnand %p127_p3, %p121_p0 }
   0xb   :  { %131 = shalt.err (!%p128_p4)
}
   0xc   :  { %19 = dma.hbm_to_vmem [thread:$0]  %s210_s0, 64, %s17_s10, [#allocation3]  }
   0xd   :  { %s140_s16 = scalar_lea.vmem %s27_s12, 64  ;;  %p145_p6 = scmp.lt.s32.totalorder %s27_s12, %s27_s12 }
   0xe   :  { %p141_p5 = scmp.ne.s32.totalorder %s27_s12, %s140_s16  ;;  %p146_p7 = scmp.lt.s32.totalorder %s140_s16, %s140_s16 }
  0x10   :  { %p147_p8 = por %p146_p7, %p145_p6 }
  0x12   :  { %p148_p9 = pnand %p147_p8, %p141_p5 }
  0x14   :  { %151 = shalt.err (!%p148_p9)
}
  0x15   :  { %29 = dma.hbm_to_vmem [thread:$0]  %s211_s1, 64, %s27_s12, [#allocation6]  }
  0x16   :  { %172 = dma.done.wait [#allocation3], 64  }
  0x17   :  { %173 = vsyncadd [#allocation3], 4294967232 }
  0x18   :  { %174 = dma.done.wait [#allocation6], 64  }
  0x19   :  { %175 = vsyncadd [#allocation6], 4294967232  ;;  %v180_v0 = vmov 0   ;;  %v181_v1 = vmov 2   ;;  %v41_v2 = vld [vmem:[#allocation5] sm:$0xf]  ;;  %v42_v7 = vlaneseq }
  0x1a   :  { %105 = vset.pattern.permute.xlu0 %v180_v0  ;;  %107 = vset.pattern.permute.xlu1 %v181_v1  ;;  %v182_v3 = vmov 1   ;;  %v183_v4 = vmov 3   ;;  %v36_v5 = vld [vmem:[#allocation2] sm:$0xf]  ;;  %v184_v16 = vmov 0.003125  }
  0x1b   :  { %45 = vperm.xlu0 %105, %v41_v2   ;;  %54 = vperm.xlu1 %107, %v41_v2   ;;  %v37_v6 = vmul.f32 0.5, %v36_v5  ;;  %v43_v11 = vand.u32 127, %v42_v7  ;;  %vm65_vm7 = vcmask 1043456   ;;  %s185_s0 = smov [#allocation7]  }
  0x1c   :  { %s85_s1 = sshll.u32 %s185_s0, 4  ;;  %s86_s1 = int_to_ptr.vmem [resolvable:$true] %s85_s1 }
  0x1d   :  { %110 = vtanh.f32 %v37_v6  ;;  %s152_s21 = scalar_lea.vmem %s86_s1, 16  ;;  %s156_s22 = scalar_lea.vmem %s86_s1, 32 }
  0x1e   :  { %p153_p10 = scmp.ne.s32.totalorder %s86_s1, %s152_s21  ;;  %p157_p11 = scmp.lt.s32.totalorder %s86_s1, %s86_s1 }
  0x1f   :  { %106 = vset.pattern.permute.xlu0 %v182_v3  ;;  %108 = vset.pattern.permute.xlu1 %v183_v4  ;;  %p158_p12 = scmp.lt.s32.totalorder %s156_s22, %s152_s21 }
  0x20   :  { %49 = vperm.xlu0 %106, %v41_v2   ;;  %59 = vperm.xlu1 %108, %v41_v2  }
  0x21   :  { %p159_p13 = por %p158_p12, %p157_p11 }
  0x23   :  { %p160_p0 = pnand %p159_p13, %p153_p10 }
  0x24   :  { %109 = vset.pattern.permute.xlu0 %v183_v4 }
  0x2a   :  { %v111_v8 = vpop.eup %110 }
  0x2b   :  { %v39_v12 = vmul.f32 0.5, %v111_v8 }
  0x2d   :  { %v40_v15 = vadd.f32 0.5, %v39_v12 }
  0x96   :  { %v46_v9 = vpop.permute.xlu0 %45  ;;  %v55_v10 = vpop.permute.xlu1 %54 }
  0x97   :  { %vm47_vm0 = vcmp.eq.s32.totalorder %v43_v11, %v46_v9  ;;  %vm56_vm3 = vcmp.eq.s32.totalorder %v43_v11, %v55_v10 }
  0x9b   :  { %v50_v13 = vpop.permute.xlu0 %49  ;;  %v60_v14 = vpop.permute.xlu1 %59 }
  0x9c   :  { %vm51_vm1 = vcmp.eq.s32.totalorder %v43_v11, %v50_v13  ;;  %vm61_vm2 = vcmp.eq.s32.totalorder %v43_v11, %v60_v14 }
  0x9d   :  { %vm52_vm4 = vmor %vm47_vm0, %vm51_vm1 }
  0x9e   :  { %vm57_vm5 = vmor %vm52_vm4, %vm56_vm3 }
  0x9f   :  { %vm62_vm6 = vmor %vm57_vm5, %vm61_vm2 }
  0xa0   :  { %v63_v17 = vsel %vm62_vm6, 0.903125, %v184_v16 }
  0xa1   :  { %v64_v18 = vmul.f32 %v63_v17, %v40_v15 }
  0xa3   :  { %v66_v19 = vsel %vm65_vm7, %v64_v18, 0.0 }
  0xa4   :  { %67 = vadd.xlane.f32.xlu1 %v66_v19 }
 0x12d   :  { %v68_v20 = vpop.xlane.xlu1 %67 }
 0x12e   :  { %v69_v21 = vrot.slane %v68_v20, 4 }
 0x130   :  { %v70_v22 = vadd.f32 %v69_v21, %v68_v20 }
 0x132   :  { %v71_v23 = vrot.slane %v70_v22, 2 }
 0x134   :  { %v72_v24 = vadd.f32 %v71_v23, %v70_v22 }
 0x136   :  { %v73_v25 = vrot.slane %v72_v24, 1 }
 0x138   :  { %v74_v26 = vadd.f32 %v73_v25, %v72_v24 }
 0x13a   :  { %95 = vpush %v74_v26 }
 0x16b   :  { %s96_s19 = spop %95 }
 0x16c   :  { %s76_s20 = ssub.f32 0.0, %s96_s19 }
 0x16e   :  { %v77_v27 = vstv %s76_s20 }
 0x16f   :  { %78 = vst [vmem:[#allocation7] sm:$0x1] %v77_v27 }
 0x170   :  { %163 = shalt.err (!%p160_p0)
}
 0x171   :  { %88 = dma.vmem_to_hbm [thread:$0]  %s86_s1, 16, %s212_s2, [#allocation4]  }
 0x172   :  { %176 = dma.done.wait [#allocation4], 16  }
 0x173   :  { %177 = vsyncadd [#allocation4], 4294967280 }
 0x174   :  { %92 = vsyncpa [#allocation3], 1 }
 0x175   :  { %93 = vsyncpa [#allocation6], 1 }
 0x176   :  { %94 = vsyncpa [#allocation4], 1 }

</bundles_post_ra>
